<compile_context>
chip_gen: v5e
topology: v5e:2x2
jax: 0.10.0
libtpu: 0.0.40
codegen_flags: <defaults>
</compile_context>

<pallas_src>
import jax
import jax.numpy as jnp
from jax.experimental import pallas as pl
from jax.experimental.pallas import tpu as pltpu


def _round_up(x, m):
    return ((x + m - 1) // m) * m


def _cdiv(a, b):
    return (a + b - 1) // b


def _default_vmem_limit_bytes():
    """Scoped-VMEM limit per chip generation.

    ~56 MiB is safe on v7x (64 MiB physical per TensorCore); v5e/v6e have
    128 MiB physical, so ~100 MiB lets a much larger bf16 weight stay fully
    resident and allows bigger x/out tiles. Unknown chips fall back to the
    conservative v7x-safe value.
    """
    try:
        kind = jax.devices()[0].device_kind.lower()
    except Exception:
        kind = ""
    if "v2" in kind or "v3" in kind:
        return 12 * 1024 * 1024
    if "v7" in kind:
        return 56 * 1024 * 1024
    if "v5" in kind or "v6" in kind:
        return 100 * 1024 * 1024
    return 56 * 1024 * 1024


def prepare_residual_linear_params(w, b, *, weight_dtype=jnp.bfloat16):
    """One-time prep of Linear(dim, dim) params for the fused kernel.

    Zero-pads D up to a lane-dense multiple of 128 (padded rows/cols
    contribute nothing) and casts W to `weight_dtype` (bf16 default halves
    weight DMA + resident VMEM; pass jnp.float32 for f32-exact fn(x)).
    Hoisted out of the forward so no per-call weight-sized HBM copies occur.
    """
    D = w.shape[0]
    assert w.shape == (D, D) and b.shape == (D,)
    Dp = _round_up(D, 128)
    if Dp != D:
        w = jnp.pad(w, ((0, Dp - D), (0, Dp - D)))
        b = jnp.pad(b, ((0, Dp - D),))
    return w.astype(weight_dtype), b.reshape(1, Dp).astype(jnp.float32)


def _residual_linear_kernel(x_ref, w_ref, b_ref, o_ref):
    """One (token tile) x (output-column tile) step of  out = x @ W + b + x.

    x_ref: (TM, Dp)  token tile, full feature width (K columns zero-padded)
    w_ref: (Dp, TN)  weight tile (resident & single-buffered when TN == Dp)
    b_ref: (1,  TN)  f32 bias tile
    o_ref: (TM, TN)  output tile
    """
    x = x_ref[...]
    # MXU matmul in the weight dtype (bf16 by default), f32 accumulation.
    y = jnp.dot(x.astype(w_ref.dtype), w_ref[...],
                preferred_element_type=jnp.float32)
    y = y + b_ref[...]

    tm, tn = o_ref.shape
    dp = x_ref.shape[-1]
    if tn == dp:
        # Weight fully resident: the residual is the whole x tile.
        x_res = x
    else:
        # N-tiled weight: residual uses the matching column slab of x.
        j = pl.program_id(1)
        start = pl.multiple_of(j * tn, 128)
        x_res = x_ref[:, pl.ds(start, tn)]

    # Residual add (the defining op of the module) in f32 with the original x.
    o_ref[...] = (y + x_res.astype(jnp.float32)).astype(o_ref.dtype)


def residual_forward(x, w_prep, b_prep, *, out_dtype=None, max_tm=512,
                     vmem_limit_bytes=None, tn=None):
    """Residual(Linear(dim, dim)) forward: out = x @ W + b + x.

    x: (B, S, D); (w_prep, b_prep) from `prepare_residual_linear_params`.
    """
    B, S, D = x.shape
    T = B * S
    Dp = w_prep.shape[0]
    assert w_prep.shape == (Dp, Dp) and b_prep.shape == (1, Dp)
    assert Dp % 128 == 0 and Dp >= D

    out_dtype = x.dtype if out_dtype is None else jnp.dtype(out_dtype)
    xb = jnp.dtype(x.dtype).itemsize
    ob = jnp.dtype(out_dtype).itemsize
    wb = jnp.dtype(w_prep.dtype).itemsize

    if vmem_limit_bytes is None:
        vmem_limit_bytes = _default_vmem_limit_bytes()
    budget = vmem_limit_bytes - 4 * 1024 * 1024   # headroom for internal scratch

    # Zero-pad ONLY the feature (K) dim; the token dim stays ragged — Pallas
    # clips the last tile's output write, so no full-array pad/copy of x on T.
    x2 = x.reshape(T, D)
    if Dp != D:
        x2 = jnp.pad(x2, ((0, 0), (0, Dp - D)))

    # ---- choose output-column tile (tn) and token tile (tm) ----------------
    if tn is None:
        per_row_full = 2 * Dp * xb + 2 * Dp * ob     # dbl-buffered x + out rows
        if Dp * Dp * wb + 8 * per_row_full <= budget:
            tn = Dp                                  # keep W fully resident
        else:
            # N-tile W (large D, e.g. bf16 D >= ~3k on v7x).  tn must divide Dp
            # so the in-kernel residual slice stays in bounds; prefer multiples
            # of 256 for the 2x256x256 v6e/v7x MXU.
            tn = 128
            for cand in (2048, 1024, 512, 256):
                if Dp % cand == 0:
                    per_row_c = 2 * Dp * xb + 2 * cand * ob
                    if 2 * Dp * cand * wb + 8 * per_row_c <= budget:
                        tn = cand
                        break
    assert Dp % tn == 0 and tn % 128 == 0

    n_n = Dp // tn
    w_buffers = 1 if n_n == 1 else 2                 # resident W is single-buffered
    w_vmem = w_buffers * Dp * tn * wb
    per_row = 2 * Dp * xb + 2 * tn * ob
    tm = max(0, budget - w_vmem) // per_row
    tm = max(8, min(max_tm, tm))
    tm = (tm // 8) * 8
    tm = min(tm, _round_up(T, 8))
    # Megacore: guarantee >= 2 token tiles so v7x's 2nd TensorCore gets work.
    if _cdiv(T, tm) < 2 and T > 8:
        tm = max(8, _round_up(_cdiv(T, 2), 8))
    n_t = _cdiv(T, tm)
    grid = (n_t, n_n)

    # Constant index_map => a second buffer would be pure VMEM waste.
    resident = dict(pipeline_mode=pl.Buffered(1)) if n_n == 1 else {}

    cost = pl.CostEstimate(
        flops=2 * T * Dp * Dp,
        transcendentals=0,
        bytes_accessed=T * Dp * (xb + ob) + Dp * Dp * wb + Dp * 4,
    )

    out = pl.pallas_call(
        _residual_linear_kernel,
        out_shape=jax.ShapeDtypeStruct((T, Dp), out_dtype),
        grid_spec=pltpu.PrefetchScalarGridSpec(
            num_scalar_prefetch=0,
            grid=grid,
            in_specs=[
                pl.BlockSpec((tm, Dp), lambda i, j: (i, 0)),              # tokens
                pl.BlockSpec((Dp, tn), lambda i, j: (0, j), **resident),  # weight
                pl.BlockSpec((1, tn), lambda i, j: (0, j), **resident),   # bias
            ],
            out_specs=pl.BlockSpec((tm, tn), lambda i, j: (i, j)),
        ),
        compiler_params=pltpu.CompilerParams(
            dimension_semantics=("parallel", "parallel"),  # independent tiles
            vmem_limit_bytes=int(vmem_limit_bytes),
        ),
        cost_estimate=cost,
    )(x2, w_prep, b_prep)

    return out[:, :D].reshape(B, S, D)


if __name__ == "__main__":
    key = jax.random.PRNGKey(0)

    # ---- case 1: resident-weight path, 2 token tiles (B=2, S=8, D=128) ----
    B, S, D = 2, 8, 128
    k1, k2, k3, key = jax.random.split(key, 4)
    x = jax.random.normal(k1, (B, S, D), dtype=jnp.float32)
    w = jax.random.normal(k2, (D, D), dtype=jnp.float32) / jnp.sqrt(D)
    b = jax.random.normal(k3, (D,), dtype=jnp.float32) * 0.01
    w_p, b_p = prepare_residual_linear_params(w, b)       # one-time prep
    out = residual_forward(x, w_p, b_p)
    jax.block_until_ready(out)
    ref = jnp.einsum("bsd,de->bse", x, w) + b + x
    assert out.shape == x.shape
    assert jnp.allclose(out, ref, atol=5e-2, rtol=5e-2), "case 1 mismatch"

    # ---- case 2: N-tiled weight path + ragged last token tile + D padding --
    B2, S2, D2 = 1, 10, 192                                # T=10 (ragged), Dp=256
    k1, k2, k3, key = jax.random.split(key, 4)
    xq = jax.random.normal(k1, (B2, S2, D2), dtype=jnp.float32)
    wq = jax.random.normal(k2, (D2, D2), dtype=jnp.float32) / jnp.sqrt(D2)
    bq = jax.random.normal(k3, (D2,), dtype=jnp.float32) * 0.01
    wq_p, bq_p = prepare_residual_linear_params(wq, bq)
    out2 = residual_forward(xq, wq_p, bq_p, tn=128)        # force N-tiled path
    jax.block_until_ready(out2)
    ref2 = jnp.einsum("bsd,de->bse", xq, wq) + bq + xq
    assert out2.shape == xq.shape
    assert jnp.allclose(out2, ref2, atol=5e-2, rtol=5e-2), "case 2 mismatch"

    print("KERNEL_OK")
</pallas_src>

<mosaic_0001>
module attributes {stable_mosaic.version = 11 : i64} {
  func.func @_residual_linear_kernel(%arg0: i32, %arg1: i32, %arg2: memref<8x128xf32, #tpu.memory_space<vmem>>, %arg3: memref<128x128xbf16, #tpu.memory_space<vmem>>, %arg4: memref<1x128xf32, #tpu.memory_space<vmem>>, %arg5: memref<8x128xf32, #tpu.memory_space<vmem>>) attributes {dimension_semantics = [#tpu.dimension_semantics<parallel>, #tpu.dimension_semantics<parallel>], iteration_bounds = array<i64: 2, 1>, scalar_prefetch = 0 : i64, scratch_operands = 0 : i64, tpu.core_type = #tpu.core_type<tc>, window_params = [{transform_indices = @transform_0, window_bounds = array<i64: 8, 128>}, {pipeline_mode = #tpu.pipeline_mode<synchronous>, transform_indices = @transform_1, window_bounds = array<i64: 128, 128>}, {pipeline_mode = #tpu.pipeline_mode<synchronous>, transform_indices = @transform_2, window_bounds = array<i64: 1, 128>}, {transform_indices = @transform_3, window_bounds = array<i64: 8, 128>}]} {
    %c0 = arith.constant 0 : index
    %c0_0 = arith.constant 0 : index
    %0 = vector.load %arg2[%c0, %c0_0] : memref<8x128xf32, #tpu.memory_space<vmem>>, vector<8x128xf32>
    %1 = arith.truncf %0 : vector<8x128xf32> to vector<8x128xbf16>
    %c0_1 = arith.constant 0 : index
    %c0_2 = arith.constant 0 : index
    %2 = vector.load %arg3[%c0_1, %c0_2] : memref<128x128xbf16, #tpu.memory_space<vmem>>, vector<128x128xbf16>
    %cst = arith.constant dense<0.000000e+00> : vector<8x128xf32>
    %3 = tpu.matmul %1, %2, %cst {dimension_numbers = #tpu.dot_dimension_numbers<[1], [0], [0], [1], [0, 0, 1, 1], [], []>} : vector<8x128xbf16>, vector<128x128xbf16>, vector<8x128xf32> -> vector<8x128xf32>
    %c0_3 = arith.constant 0 : index
    %c0_4 = arith.constant 0 : index
    %4 = vector.load %arg4[%c0_3, %c0_4] : memref<1x128xf32, #tpu.memory_space<vmem>>, vector<1x128xf32>
    %5 = vector.broadcast %4 : vector<1x128xf32> to vector<8x128xf32>
    %6 = arith.addf %3, %5 : vector<8x128xf32>
    %7 = arith.addf %6, %0 : vector<8x128xf32>
    %c0_5 = arith.constant 0 : index
    %c0_6 = arith.constant 0 : index
    %8 = vector.load %arg5[%c0_5, %c0_6] : memref<8x128xf32, #tpu.memory_space<vmem>>, vector<8x128xf32>
    tpu.vector_store %arg5[%c0_5, %c0_6], %7 {strides = array<i32>} : memref<8x128xf32, #tpu.memory_space<vmem>>, vector<8x128xf32>,
    return
  }
  func.func @transform_0(%arg0: i32, %arg1: i32) -> (i32, i32) {
    %c0_i32 = arith.constant 0 : i32
    %c0_i32_0 = arith.constant 0 : i32
    return %arg0, %c0_i32 : i32, i32
  }
  func.func @transform_1(%arg0: i32, %arg1: i32) -> (i32, i32) {
    %c0_i32 = arith.constant 0 : i32
    %c0_i32_0 = arith.constant 0 : i32
    return %c0_i32, %arg1 : i32, i32
  }
  func.func @transform_2(%arg0: i32, %arg1: i32) -> (i32, i32) {
    %c0_i32 = arith.constant 0 : i32
    %c0_i32_0 = arith.constant 0 : i32
    return %c0_i32, %arg1 : i32, i32
  }
  func.func @transform_3(%arg0: i32, %arg1: i32) -> (i32, i32) {
    %c0_i32 = arith.constant 0 : i32
    return %arg0, %arg1 : i32, i32
  }
}

</mosaic_0001>

<bundles_post_ra>
// kernel: tpu_custom_call.1
= control target key start
LH: loop header
LB: loop body
LE: loop exit
PB: predicated region body
PF: predicated region fallthrough
CT: control target
= control target key end

     0   :  { %8 = vsyncpa [#allocation3], 0  ;;  %s898_s0 = inlined_call_operand.hbm [shape: f32[16,128], index: 0, kind: input, shape index: {}]   ;;  %s899_s1 = inlined_call_operand.hbm [shape: bf16[128,128], index: 1, kind: input, shape index: {}]   ;;  %s900_s2 = inlined_call_operand.vmem [shape: f32[1,128], index: 2, kind: input, shape index: {}]   ;;  %s901_s3 = inlined_call_operand.hbm [shape: f32[16,128], index: 3, kind: output, shape index: {}]  }
   0x1   :  { %10 = vsyncpa [#allocation3 + $0x1], 0 }
   0x2   :  { %11 = vsyncpa [#allocation6], 0 }
   0x3   :  { %12 = vsyncpa [#allocation4], 0 }
   0x4   :  { %14 = vsyncpa [#allocation4 + $0x1], 0  ;;  %s748_s12 = smov 0   ;;  %s750_s13 = smov 0  }
   0x5   :  { %s752_s14 = smov 0   ;;  %s754_s15 = smov 0  }
   0x6   :  { %s756_s16 = smov 0   ;;  %s758_s17 = smov 0  }
   0x7 LB: > { %s445_s18 = sadd.s32 4294967295, %s723_s17   ;;  %p447_p0 = scmp.ge.s32.totalorder %s723_s17, 1  ;;  %s723_s17 = sphi %s758_s17, %s20_s17   ;;  %s719_s16 = sphi %s756_s16, %s912_s16   ;;  %s715_s15 = sphi %s754_s15, %s911_s15   ;;  %s711_s14 = sphi %s752_s14, %s910_s14   ;;  %s707_s13 = sphi %s750_s13, %s909_s13   ;;  %s703_s12 = sphi %s748_s12, %s908_s12  }
   0x8   : > { %p780_p1 = scmp.eq.s32.totalorder %s445_s18, 0  ;;  %p143_p2 = scmp.lt.s32.totalorder %s723_s17, 3 }
   0x9   : > { %s156_s22 = sshll.u32 %s899_s1, 4  ;;  %s725_s24 = smov [#allocation5]   ;;  %s157_s22 = int_to_ptr.hbm [resolvable:$true] %s156_s22 }
   0xa   : > { %p788_p3 = pnand %p447_p0, %p143_p2  ;;  %s158_s25 = sshll.u32 %s725_s24, 4  ;;  %s159_s25 = int_to_ptr.vmem [resolvable:$true] %s158_s25 }
   0xb   : > { %p450_p6 = scmp.ge.s32.totalorder %s723_s17, 2  ;;  %s726_s26 = smov 64  }
   0xc   : > { %p509_p4 = pneg %p788_p3  ;;  %s727_s27 = smov 4  }
   0xd   : > { %s446_s28 = sadd.s32 4294967294, %s723_s17   ;;  %s32_s29 = sadd.s32 1, %s719_s16 }
   0xe   : > { %p510_p5 = pnand %p509_p4, %p780_p1  ;;  %s39_s30 = sadd.s32 1, %s711_s14 }
   0xf   : > { %p34_p7 = scmp.ge.s32.totalorder %s32_s29, 2  ;;  %p46_p8 = scmp.ne.s32.totalorder %s711_s14, %s707_s13 }
  0x10   : > { %512 = dma.hbm_to_vmem [thread:$0]  (!%p510_p5), %s157_s22, 1024, %s159_s25, [#allocation6], %s726_s26, %s726_s26, %s727_s27  }
  0x11   : > { %p47_p9 = scmp.eq.s32.totalorder %s723_s17, 0  ;;  %p52_p10 = scmp.ne.s32.totalorder %s707_s13, %s703_s12 }
  0x12   : > { %s914_s29 = smov (%p34_p7, %s32_s29), 0  ;;  %p130_p13 = scmp.eq.s32.totalorder %s445_s18, 1 }
  0x13   : > { %p807_p11 = por %p47_p9, %p46_p8  ;;  %p813_p12 = por %p780_p1, %p52_p10 }
  0x14   : > { %s36_s6 = ssub.s32 %s719_s16, %s914_s29  ;;  %p136_p2 = scmp.eq.s32.totalorder %s446_s28, 1 }
  0x15   : > { %p37_p0 = scmp.eq.s32.totalorder %s36_s6, 0  ;;  %p819_p4 = por %p130_p13, %p46_p8 }
  0x16   : > { %p522_p5 = scmp.lt.s32.totalorder %s723_s17, 2  ;;  %p827_p7 = por %p136_p2, %p52_p10 }
  0x17   : > { %s825_s8 = scalar_select %p37_p0, %s711_s14, %s39_s30  }
  0x18   : > { %s178_s10 = sand.u32 1, %s711_s14   ;;  %s452_s20 = sshll.u32 %s719_s16, 3 }
  0x19   : > { %s451_s11 = sshll.u32 %s178_s10, 3  ;;  %s186_s18 = scalar_lea.hbm %s898_s0, %s452_s20 }
  0x1a   : > { %s182_s24 = scalar_lea.vmem [#allocation2], %s451_s11  ;;  %s188_s26 = sshll.u32 %s186_s18, 4  ;;  %s189_s26 = int_to_ptr.hbm [resolvable:$true] %s188_s26 }
  0x1b   : > { %s190_s25 = sshll.u32 %s182_s24, 4  ;;  %p514_p8 = pnand %p522_p5, %p807_p11  ;;  %s191_s25 = int_to_ptr.vmem [resolvable:$true] %s190_s25 }
  0x1c   : > { %s179_s27 = scalar_lea.sflag [#allocation3], %s178_s10  ;;  %199 = sbr.rel (%p788_p3) target bundleno = 202 (0xca), region = 32 }
  0x1d   : > { %516 = dma.hbm_to_vmem [thread:$0]  (!%p514_p8), %s189_s26, 128, %s191_s25, %s179_s27  }
  0x1e   : > { %s841_s28 = sand.u32 (!%p788_p3), 1, %s707_s13  }
  0x1f   : > { %s454_s30 = sshll.u32 (!%p788_p3), %s841_s28, 3  ;;  %s202_s6 = scalar_lea.sflag (!%p788_p3), [#allocation3], %s841_s28 }
  0x20   : > { %s205_s11 = scalar_lea.vmem (!%p788_p3), [#allocation2], %s454_s30 }
  0x21   : > { %690 = dma.done.wait (%p813_p12), %s202_s6, 128  }
  0x22   : > { %692 = vsyncadd (%p813_p12), %s202_s6, 4294967168 }
  0x23   : > { %694 = dma.done.wait (%p780_p1), [#allocation6], 1024  }
  0x24   : > { %696 = vsyncadd (%p780_p1), [#allocation6], 4294966272  ;;  %v500_v0 = vld [vmem:[#allocation5 + $0x38] sm:$0xff]  ;;  %v499_v1 = vld [vmem:[#allocation5 + $0x30] sm:$0xff]  ;;  %s490_s19 = sshll.u32 %s715_s15, 3  ;;  %s236_s21 = scalar_lea.vmem [#allocation7], %s454_s30 }
  0x25   : > { %310 = vmatpush.bf16.msra.mxu0 %v500_v0  ;;  %v498_v2 = vld [vmem:[#allocation5 + $0x28] sm:$0xff]  ;;  %v497_v3 = vld [vmem:[#allocation5 + $0x20] sm:$0xff]  ;;  %v496_v4 = vld [vmem:[#allocation5 + $0x18] sm:$0xff]  ;;  %s337_s20 = scalar_lea.hbm %s901_s3, %s490_s19  ;;  %s339_s22 = sshll.u32 %s236_s21, 4  ;;  %s340_s22 = int_to_ptr.vmem [resolvable:$true] %s339_s22 }
  0x26   : > { %v495_v5 = vld [vmem:[#allocation5 + $0x10] sm:$0xff]  ;;  %v494_v6 = vld [vmem:[#allocation5 + $0x8] sm:$0xff]  ;;  %v493_v7 = vld [vmem:[#allocation5] sm:$0xff]  ;;  %s341_s18 = sshll.u32 %s337_s20, 4  ;;  %s326_s15 = scalar_lea.sflag [#allocation4], %s841_s28  ;;  %s342_s18 = int_to_ptr.hbm [resolvable:$true] %s341_s18 }
  0x27   : > { %v240_v8 = vld [vmem:[%s205_s11] sm:$0xff]  ;;  %s651_s24 = sshra.s32 %s342_s18, 4  ;;  %s657_s6 = scalar_lea.hbm %s901_s3, 16  ;;  %s652_s24 = int_to_ptr.hbm [resolvable:$true] %s651_s24 }
  0x28   : > { %v241_v9 = vpack.c.bf16 %v240_v8, %v240_v8  ;;  %v576_v10 = vld [vmem:[%s900_s2] ss:$0 sm:$0xff]  ;;  %s653_s25 = scalar_lea.hbm %s652_s24, 8  ;;  %p658_p10 = scmp.lt.s32.totalorder %s652_s24, %s901_s3 }
  0x29   : > { %311 = vmatpush.bf16.msra.mxu0 %v499_v1  ;;  %p654_p1 = scmp.ne.s32.totalorder %s652_s24, %s653_s25  ;;  %p659_p11 = scmp.lt.s32.totalorder %s657_s6, %s653_s25 }
  0x2b   : > { %p655_p3 = pnand %p654_p1, %p819_p4  ;;  %p660_p12 = por %p659_p11, %p658_p10 }
  0x2d   : > { %312 = vmatpush.bf16.msra.mxu0 %v498_v2  ;;  %p656_p9 = pneg %p655_p3 }
  0x2f   : > { %p661_p13 = pnand %p660_p12, %p656_p9 }
  0x31   : > { %313 = vmatpush.bf16.msra.mxu0 %v497_v3 }
  0x35   : > { %314 = vmatpush.bf16.msra.mxu0 %v496_v4 }
  0x39   : > { %315 = vmatpush.bf16.msra.mxu0 %v495_v5 }
  0x3d   : > { %316 = vmatpush.bf16.msra.mxu0 %v494_v6 }
  0x41   : > { %317 = vmatpush.bf16.msra.mxu0 %v493_v7 }
  0x44   : > { %318 = vmatmul.bf16.vlgmr.msra.gmra.mxu0 %v241_v9 }
  0xc1   : > { %v319_v11 = vpop.f32.mrf.mxu0 }
  0xc2   : > { %v320_v12 = vadd.f32 %v576_v10, %v319_v11 }
  0xc4   : > { %v323_v13 = vadd.f32 %v320_v12, %v240_v8 }
  0xc6   : > { %324 = vst [vmem:[%s236_s21] sm:$0xff] %v323_v13 }
  0xc7   : > { %664 = shalt.err (!%p661_p13)
}
  0xc8   : > { %507 = dma.vmem_to_hbm [thread:$0]  (%p819_p4), %s340_s22, 128, %s342_s18, %s326_s15  }
  0xc9   : > { %v321_v14 = vpop.f32.mrf.mxu0 }
  0xca PF: > { %s353_s28 = sand.u32 1, %s703_s12   ;;  %p518_p0 = pnand %p450_p6, %p827_p7 }
  0xcb   : > { %s354_s19 = scalar_lea.sflag [#allocation4], %s353_s28 }
  0xcc   : > { %p519_p2 = pneg %p518_p0 }
  0xce   : > { %698 = dma.done.wait (%p519_p2), %s354_s19, 128  }
  0xcf   : > { %700 = vsyncadd (%p519_p2), %s354_s19, 4294967168  ;;  %s20_s17 = sadd.s32 1, %s723_s17   ;;  %s908_s12 = smov %s707_s13 }
  0xd0   : > { %p17_p5 = scmp.ge.s32.totalorder %s20_s17, 4   ;;  %s909_s13 = smov %s711_s14 }
  0xd1   : > { %s910_s14 = smov %s825_s8  ;;  %s911_s15 = smov %s719_s16 }
  0xd2   : > { %s912_s16 = smov %s914_s29  ;;  %19 = sbr.rel (!%p17_p5) target bundleno = 7 (0x7), region = 85 }
  0xd7   :  { %360 = vsyncpa [#allocation3], 1 }
  0xd8   :  { %362 = vsyncpa [#allocation3 + $0x1], 1 }
  0xd9   :  { %363 = vsyncpa [#allocation6], 1 }
  0xda   :  { %364 = vsyncpa [#allocation4], 1 }
  0xdb   :  { %366 = vsyncpa [#allocation4 + $0x1], 1 }

</bundles_post_ra>
